<compile_context>
chip_gen: v6e
topology: v6e:2x2x1
jax: 0.10.0
libtpu: 0.0.40
codegen_flags: <defaults>
</compile_context>

<pallas_src>
import functools

import jax
import jax.numpy as jnp
from jax.experimental import pallas as pl
from jax.experimental.pallas import tpu as pltpu

LANE = 128
NEG_BIG = -1e30  # finite "-inf" for masking padded class lanes


def _round_up(v, m):
    return (v + m - 1) // m * m


def _pad2d(a, rows, cols):
    return jnp.pad(a, ((0, rows - a.shape[0]), (0, cols - a.shape[1])))


# ----------------------------- kernels -----------------------------

def linear_kernel(x_ref, w_ref, out_ref):
    """out_strip = x_strip @ w   (bf16 operands, f32 MXU accumulation)."""
    acc = jnp.dot(x_ref[...], w_ref[...], preferred_element_type=jnp.float32)
    out_ref[...] = acc.astype(out_ref.dtype)


def propagate_kernel(adj_ref, feat_ref, out_ref):
    """out_strip = adj_strip @ feat   (bf16 operands, f32 MXU accumulation)."""
    acc = jnp.dot(adj_ref[...], feat_ref[...], preferred_element_type=jnp.float32)
    out_ref[...] = acc.astype(out_ref.dtype)


def propagate_logsoftmax_kernel(adj_ref, feat_ref, b_ref, out_ref, *, num_classes):
    """out_strip = log_softmax(adj_strip @ feat + b) over the real class lanes."""
    z = jnp.dot(adj_ref[...], feat_ref[...], preferred_element_type=jnp.float32)
    z = z + b_ref[...]
    # Mask padded class lanes so the (padded-to-128) softmax axis is correct.
    lane = jax.lax.broadcasted_iota(jnp.int32, z.shape, 1)
    z = jnp.where(lane < num_classes, z, NEG_BIG)
    m = jnp.max(z, axis=1, keepdims=True)
    s = z - m
    lse = jnp.log(jnp.sum(jnp.exp(s), axis=1, keepdims=True))
    out_ref[...] = s - lse


# ----------------------------- wrapper -----------------------------

def sgc_forward(adj_hat, x, w, b, *, k=2, tm=None):
    n, in_feats = x.shape
    out_feats = w.shape[1]

    in_pad = _round_up(in_feats, LANE)
    f_pad = _round_up(out_feats, LANE)
    if tm is None:
        tm = 256 if n >= 256 else _round_up(n, 8)
    n_pad = _round_up(n, tm)
    grid = (n_pad // tm,)

    # bf16 MXU operands; zero padding keeps the math exact for real rows/cols.
    adj_p = _pad2d(adj_hat, n_pad, n_pad).astype(jnp.bfloat16)
    x_p = _pad2d(x, n_pad, in_pad).astype(jnp.bfloat16)
    w_p = _pad2d(w, in_pad, f_pad).astype(jnp.bfloat16)
    b_p = _pad2d(b, 1, f_pad).astype(jnp.float32)

    cparams = pltpu.CompilerParams(
        dimension_semantics=("parallel",),      # row strips shard across TCs
        vmem_limit_bytes=48 * 1024 * 1024,      # above 32 MiB scoped default
    )

    adj_bytes = n_pad * n_pad * 2
    feat_bytes = n_pad * f_pad * 2

    # ---- 1) feature transform first: xw = x @ w ----
    xw = pl.pallas_call(
        linear_kernel,
        out_shape=jax.ShapeDtypeStruct((n_pad, f_pad), jnp.bfloat16),
        grid=grid,
        in_specs=[
            pl.BlockSpec((tm, in_pad), lambda i: (i, 0)),
            pl.BlockSpec((in_pad, f_pad), lambda i: (0, 0)),
        ],
        out_specs=pl.BlockSpec((tm, f_pad), lambda i: (i, 0)),
        compiler_params=cparams,
        cost_estimate=pl.CostEstimate(
            flops=2 * n_pad * in_pad * f_pad,
            transcendentals=0,
            bytes_accessed=n_pad * in_pad * 2 + in_pad * f_pad * 2 + feat_bytes,
        ),
    )(x_p, w_p)

    # ---- 2) first k-1 propagations: feat = adj_hat @ feat ----
    feat = xw
    for _ in range(k - 1):
        feat = pl.pallas_call(
            propagate_kernel,
            out_shape=jax.ShapeDtypeStruct((n_pad, f_pad), jnp.bfloat16),
            grid=grid,
            in_specs=[
                pl.BlockSpec((tm, n_pad), lambda i: (i, 0)),
                pl.BlockSpec((n_pad, f_pad), lambda i: (0, 0)),
            ],
            out_specs=pl.BlockSpec((tm, f_pad), lambda i: (i, 0)),
            compiler_params=cparams,
            cost_estimate=pl.CostEstimate(
                flops=2 * n_pad * n_pad * f_pad,
                transcendentals=0,
                bytes_accessed=adj_bytes + 2 * feat_bytes,
            ),
        )(adj_p, feat)

    # ---- 3) last propagation + bias + log_softmax ----
    out_pad = pl.pallas_call(
        functools.partial(propagate_logsoftmax_kernel, num_classes=out_feats),
        out_shape=jax.ShapeDtypeStruct((n_pad, f_pad), jnp.float32),
        grid=grid,
        in_specs=[
            pl.BlockSpec((tm, n_pad), lambda i: (i, 0)),
            pl.BlockSpec((n_pad, f_pad), lambda i: (0, 0)),
            pl.BlockSpec((1, f_pad), lambda i: (0, 0)),
        ],
        out_specs=pl.BlockSpec((tm, f_pad), lambda i: (i, 0)),
        compiler_params=cparams,
        cost_estimate=pl.CostEstimate(
            flops=2 * n_pad * n_pad * f_pad + 6 * n_pad * f_pad,
            transcendentals=n_pad * f_pad + n_pad,
            bytes_accessed=adj_bytes + feat_bytes + f_pad * 4 + n_pad * f_pad * 4,
        ),
    )(adj_p, feat, b_p)

    # Slice off row/class padding outside the kernel (padding is all zeros /
    # masked lanes, so real entries are untouched).
    return out_pad[:n, :out_feats]


# --------------------------- test helpers ---------------------------

def make_sym_norm_adj(key, n):
    """Random undirected graph, self-loops added, symmetric normalization."""
    a = (jax.random.uniform(key, (n, n)) < 0.1).astype(jnp.float32)
    a = jnp.maximum(a, a.T)                      # symmetrize
    a = a * (1.0 - jnp.eye(n)) + jnp.eye(n)      # self loops
    deg = jnp.sum(a, axis=1)
    d_inv_sqrt = 1.0 / jnp.sqrt(deg)
    return a * d_inv_sqrt[:, None] * d_inv_sqrt[None, :]


def glorot(key, shape):
    fan_in, fan_out = shape
    limit = jnp.sqrt(6.0 / (fan_in + fan_out))
    return jax.random.uniform(key, shape, jnp.float32, -limit, limit)


if __name__ == "__main__":
    # Small shapes consistent with the module: N nodes, in_feats -> out_feats classes, k=2.
    N, IN_FEATS, OUT_FEATS, K = 64, 16, 8, 2

    key = jax.random.PRNGKey(0)
    k_adj, k_x, k_w = jax.random.split(key, 3)

    adj_hat = make_sym_norm_adj(k_adj, N)
    x = jax.random.normal(k_x, (N, IN_FEATS), jnp.float32)
    w = glorot(k_w, (IN_FEATS, OUT_FEATS))        # SGConv's single linear layer
    b = jnp.zeros((1, OUT_FEATS), jnp.float32)
    # TODO(synk): n_units / dropout / activation ctor args of SGC are unused by
    #             SGConv(k=2)'s forward, so they are intentionally not modeled.

    out = sgc_forward(adj_hat, x, w, b, k=K)
    jax.block_until_ready(out)

    # Pure-JAX reference with matching bf16-operand / f32-accumulate precision.
    def bf(v):
        return v.astype(jnp.bfloat16).astype(jnp.float32)

    xw_r = bf(jnp.dot(bf(x), bf(w), preferred_element_type=jnp.float32))
    feat_r = xw_r
    for _ in range(K - 1):
        feat_r = bf(jnp.dot(bf(adj_hat), feat_r, preferred_element_type=jnp.float32))
    z_r = jnp.dot(bf(adj_hat), feat_r, preferred_element_type=jnp.float32) + b
    ref = jax.nn.log_softmax(z_r, axis=1)

    assert out.shape == (N, OUT_FEATS)
    assert jnp.allclose(out, ref, atol=1e-3, rtol=1e-3), "mismatch vs reference"

    print("KERNEL_OK")
</pallas_src>

<mosaic_0001>
module attributes {stable_mosaic.version = 11 : i64} {
  func.func @linear_kernel(%arg0: i32, %arg1: memref<64x128xbf16, #tpu.memory_space<vmem>>, %arg2: memref<128x128xbf16, #tpu.memory_space<vmem>>, %arg3: memref<64x128xbf16, #tpu.memory_space<vmem>>) attributes {dimension_semantics = [#tpu.dimension_semantics<parallel>], iteration_bounds = array<i64: 1>, scalar_prefetch = 0 : i64, scratch_operands = 0 : i64, tpu.core_type = #tpu.core_type<tc>, window_params = [{transform_indices = @transform_0, window_bounds = array<i64: 64, 128>}, {pipeline_mode = #tpu.pipeline_mode<synchronous>, transform_indices = @transform_1, window_bounds = array<i64: 128, 128>}, {transform_indices = @transform_2, window_bounds = array<i64: 64, 128>}]} {
    %c0 = arith.constant 0 : index
    %c0_0 = arith.constant 0 : index
    %0 = vector.load %arg1[%c0, %c0_0] : memref<64x128xbf16, #tpu.memory_space<vmem>>, vector<64x128xbf16>
    %c0_1 = arith.constant 0 : index
    %c0_2 = arith.constant 0 : index
    %1 = vector.load %arg2[%c0_1, %c0_2] : memref<128x128xbf16, #tpu.memory_space<vmem>>, vector<128x128xbf16>
    %cst = arith.constant dense<0.000000e+00> : vector<64x128xf32>
    %2 = tpu.matmul %0, %1, %cst {dimension_numbers = #tpu.dot_dimension_numbers<[1], [0], [0], [1], [0, 0, 1, 1], [], []>} : vector<64x128xbf16>, vector<128x128xbf16>, vector<64x128xf32> -> vector<64x128xf32>
    %3 = arith.truncf %2 : vector<64x128xf32> to vector<64x128xbf16>
    %c0_3 = arith.constant 0 : index
    %c0_4 = arith.constant 0 : index
    %4 = vector.load %arg3[%c0_3, %c0_4] : memref<64x128xbf16, #tpu.memory_space<vmem>>, vector<64x128xbf16>
    tpu.vector_store %arg3[%c0_3, %c0_4], %3 {strides = array<i32>} : memref<64x128xbf16, #tpu.memory_space<vmem>>, vector<64x128xbf16>,
    return
  }
  func.func @transform_0(%arg0: i32) -> (i32, i32) {
    %c0_i32 = arith.constant 0 : i32
    %c0_i32_0 = arith.constant 0 : i32
    return %arg0, %c0_i32 : i32, i32
  }
  func.func @transform_1(%arg0: i32) -> (i32, i32) {
    %c0_i32 = arith.constant 0 : i32
    %c0_i32_0 = arith.constant 0 : i32
    %c0_i32_1 = arith.constant 0 : i32
    return %c0_i32, %c0_i32_0 : i32, i32
  }
  func.func @transform_2(%arg0: i32) -> (i32, i32) {
    %c0_i32 = arith.constant 0 : i32
    %c0_i32_0 = arith.constant 0 : i32
    return %arg0, %c0_i32 : i32, i32
  }
}

</mosaic_0001>

<bundles_post_ra>
// kernel: tpu_custom_call.1
= control target key start
LH: loop header
LB: loop body
LE: loop exit
PB: predicated region body
PF: predicated region fallthrough
CT: control target
= control target key end

     0   :  { %7 = vsyncpa [#allocation3], 0  ;;  %s484_s0 = inlined_call_operand.hbm [shape: bf16[64,128], index: 0, kind: input, shape index: {}]   ;;  %s485_s1 = inlined_call_operand.hbm [shape: bf16[128,128], index: 1, kind: input, shape index: {}]   ;;  %s486_s2 = inlined_call_operand.hbm [shape: bf16[64,128], index: 2, kind: output, shape index: {}]  }
   0x1   :  { %8 = vsyncpa [#allocation6], 0 }
   0x2   :  { %9 = vsyncpa [#allocation4], 0  ;;  %s446_s9 = smov [#allocation2]  }
   0x3   :  { %s15_s10 = sshll.u32 %s446_s9, 4  ;;  %s16_s10 = int_to_ptr.vmem [resolvable:$true] %s15_s10 }
   0x4   :  { %s388_s11 = scalar_lea.vmem %s16_s10, 512  ;;  %p393_p1 = scmp.lt.s32.totalorder %s16_s10, %s16_s10 }
   0x5   :  { %p389_p0 = scmp.ne.s32.totalorder %s16_s10, %s388_s11  ;;  %p394_p2 = scmp.lt.s32.totalorder %s388_s11, %s388_s11 }
   0x7   :  { %p395_p3 = por %p394_p2, %p393_p1 }
   0x9   :  { %p396_p4 = pnand %p395_p3, %p389_p0 }
   0xb   :  { %399 = shalt.err (!%p396_p4)
}
   0xc   :  { %s447_s12 = smov 64   ;;  %s448_s13 = smov 4  }
   0xd   :  { %21 = dma.hbm_to_vmem [thread:$0]  %s484_s0, 512, %s16_s10, [#allocation3], %s447_s12, %s447_s12, %s448_s13  }
   0xe   :  { %s449_s16 = smov [#allocation5]  }
   0xf   :  { %s27_s17 = sshll.u32 %s449_s16, 4  ;;  %s28_s17 = int_to_ptr.vmem [resolvable:$true] %s27_s17 }
  0x10   :  { %s408_s18 = scalar_lea.vmem %s28_s17, 1024  ;;  %p413_p6 = scmp.lt.s32.totalorder %s28_s17, %s28_s17 }
  0x11   :  { %p409_p5 = scmp.ne.s32.totalorder %s28_s17, %s408_s18  ;;  %p414_p7 = scmp.lt.s32.totalorder %s408_s18, %s408_s18 }
  0x13   :  { %p415_p8 = por %p414_p7, %p413_p6 }
  0x15   :  { %p416_p9 = pnand %p415_p8, %p409_p5 }
  0x17   :  { %419 = shalt.err (!%p416_p9)
}
  0x18   :  { %33 = dma.hbm_to_vmem [thread:$0]  %s485_s1, 1024, %s28_s17, [#allocation6], %s447_s12, %s447_s12, %s448_s13  }
  0x19   :  { %440 = dma.done.wait [#allocation3], 512  }
  0x1a   :  { %441 = vsyncadd [#allocation3], 4294966784 }
  0x1b   :  { %442 = dma.done.wait [#allocation6], 1024  }
  0x1c   :  { %443 = vsyncadd [#allocation6], 4294966272  ;;  %v368_v0 = vld [vmem:[#allocation5 + $0x38] sm:$0xff]   ;;  %v369_v1 = vld [vmem:[#allocation5 + $0x30] sm:$0xff]   ;;  %s450_s0 = smov [#allocation7]  }
  0x1d   :  { %323 = vmatprep.subr.bf16.mxu0 %v368_v0  ;;  %347 = vmatprep.subr.bf16.mxu1 %v368_v0  ;;  %v370_v2 = vld [vmem:[#allocation5 + $0x28] sm:$0xff]   ;;  %v371_v3 = vld [vmem:[#allocation5 + $0x20] sm:$0xff]   ;;  %v377_v5 = vld [vmem:[#allocation2 + $0x10] sm:$0xff]   ;;  %s247_s1 = sshll.u32 %s450_s0, 4  ;;  %s248_s1 = int_to_ptr.vmem [resolvable:$true] %s247_s1 }
  0x1e   :  { %324 = vmatpush3.bf16.msra.mxu0 %v368_v0  ;;  %355 = vmatpush3.bf16.msra.mxu1 %v368_v0  ;;  %v376_v4 = vld [vmem:[#allocation2] sm:$0xff]   ;;  %v372_v6 = vld [vmem:[#allocation5 + $0x18] sm:$0xff]   ;;  %v373_v7 = vld [vmem:[#allocation5 + $0x10] sm:$0xff]   ;;  %s420_s21 = scalar_lea.vmem %s248_s1, 512  ;;  %p425_p11 = scmp.lt.s32.totalorder %s248_s1, %s248_s1 }
  0x1f   :  { %325 = vmatprep.subr.bf16.mxu0 %v369_v1  ;;  %348 = vmatprep.subr.bf16.mxu1 %v369_v1  ;;  %v374_v8 = vld [vmem:[#allocation5 + $0x8] sm:$0xff]   ;;  %v375_v9 = vld [vmem:[#allocation5] sm:$0xff]   ;;  %v379_v11 = vld [vmem:[#allocation2 + $0x18] sm:$0xff]   ;;  %p421_p10 = scmp.ne.s32.totalorder %s248_s1, %s420_s21  ;;  %p426_p12 = scmp.lt.s32.totalorder %s420_s21, %s420_s21 }
  0x20   :  { %339 = vmatprep.mubr.bf16.mxu0 %v376_v4  ;;  %343 = vmatprep.mubr.bf16.mxu1 %v377_v5  ;;  %v378_v10 = vld [vmem:[#allocation2 + $0x8] sm:$0xff]  }
  0x21   :  { %p427_p13 = por %p426_p12, %p425_p11 }
  0x22   :  { %326 = vmatpush3.bf16.msra.mxu0 %v369_v1  ;;  %356 = vmatpush3.bf16.msra.mxu1 %v369_v1 }
  0x23   :  { %327 = vmatprep.subr.bf16.mxu0 %v370_v2  ;;  %349 = vmatprep.subr.bf16.mxu1 %v370_v2  ;;  %p428_p0 = pnand %p427_p13, %p421_p10 }
  0x26   :  { %328 = vmatpush3.bf16.msra.mxu0 %v370_v2  ;;  %357 = vmatpush3.bf16.msra.mxu1 %v370_v2 }
  0x27   :  { %329 = vmatprep.subr.bf16.mxu0 %v371_v3  ;;  %350 = vmatprep.subr.bf16.mxu1 %v371_v3 }
  0x2a   :  { %330 = vmatpush3.bf16.msra.mxu0 %v371_v3  ;;  %358 = vmatpush3.bf16.msra.mxu1 %v371_v3 }
  0x2b   :  { %331 = vmatprep.subr.bf16.mxu0 %v372_v6  ;;  %351 = vmatprep.subr.bf16.mxu1 %v372_v6 }
  0x2e   :  { %332 = vmatpush3.bf16.msra.mxu0 %v372_v6  ;;  %359 = vmatpush3.bf16.msra.mxu1 %v372_v6 }
  0x2f   :  { %333 = vmatprep.subr.bf16.mxu0 %v373_v7  ;;  %352 = vmatprep.subr.bf16.mxu1 %v373_v7 }
  0x32   :  { %334 = vmatpush3.bf16.msra.mxu0 %v373_v7  ;;  %360 = vmatpush3.bf16.msra.mxu1 %v373_v7 }
  0x33   :  { %335 = vmatprep.subr.bf16.mxu0 %v374_v8  ;;  %353 = vmatprep.subr.bf16.mxu1 %v374_v8 }
  0x36   :  { %336 = vmatpush3.bf16.msra.mxu0 %v374_v8  ;;  %361 = vmatpush3.bf16.msra.mxu1 %v374_v8 }
  0x37   :  { %337 = vmatprep.subr.bf16.mxu0 %v375_v9  ;;  %354 = vmatprep.subr.bf16.mxu1 %v375_v9 }
  0x3a   :  { %338 = vmatpush3.bf16.msra.mxu0 %v375_v9  ;;  %362 = vmatpush3.bf16.msra.mxu1 %v375_v9 }
  0x3d   :  { %340 = vmatmul.mubr.bf16.vlgmr.msra.gmra.mxu0 %v378_v10  ;;  %344 = vmatmul.mubr.bf16.vlgmr.msra.gmra.mxu1 %v379_v11 }
  0xfd   :  { %v341_v12 = vpop.f32.mrf.mxu0  ;;  %v345_v13 = vpop.f32.mrf.mxu1 }
  0xff   :  { %v171_v14 = vpop.f32.mrf.mxu0  ;;  %v187_v15 = vpop.f32.mrf.mxu1 }
 0x101   :  { %v342_v16 = vpop.f32.mrf.mxu0  ;;  %v346_v17 = vpop.f32.mrf.mxu1 }
 0x102   :  { %v296_v18 = vpack.c.bf16 %v342_v16, %v341_v12  ;;  %v306_v19 = vpack.c.bf16 %v346_v17, %v345_v13 }
 0x103   :  { %v174_v20 = vpop.f32.mrf.mxu0  ;;  %v190_v21 = vpop.f32.mrf.mxu1 }
 0x104   :  { %308 = vst [vmem:[#allocation7 + $0x8] sm:$0xff] %v296_v18   ;;  %310 = vst [vmem:[#allocation7 + $0x18] sm:$0xff] %v306_v19   ;;  %v291_v22 = vpack.c.bf16 %v174_v20, %v171_v14  ;;  %v301_v23 = vpack.c.bf16 %v190_v21, %v187_v15 }
 0x106   :  { %292 = vst [vmem:[#allocation7] sm:$0xff] %v291_v22   ;;  %309 = vst [vmem:[#allocation7 + $0x10] sm:$0xff] %v301_v23  }
 0x107   :  { %431 = shalt.err (!%p428_p0)
}
 0x108   :  { %253 = dma.vmem_to_hbm [thread:$0]  %s248_s1, 512, %s486_s2, [#allocation4], %s447_s12, %s447_s12, %s448_s13  }
 0x109   :  { %444 = dma.done.wait [#allocation4], 512  }
 0x10a   :  { %445 = vsyncadd [#allocation4], 4294966784 }
 0x10b   :  { %257 = vsyncpa [#allocation3], 1 }
 0x10c   :  { %258 = vsyncpa [#allocation6], 1 }
 0x10d   :  { %259 = vsyncpa [#allocation4], 1 }

</bundles_post_ra>
